<compile_context>
chip_gen: v7x
topology: tpu7x:2x2x1
jax: 0.10.0
libtpu: 0.0.40
codegen_flags: <defaults>
</compile_context>

<pallas_src>
import functools

import jax
import jax.numpy as jnp
import numpy as np
from jax.experimental import pallas as pl
from jax.experimental.pallas import tpu as pltpu


def _round_up(x, m):
    return ((x + m - 1) // m) * m


def _trilinear_kernel(lut_ref, x_ref, o_ref, *, dim, dim_pad):
    """One tile of pixels (channel-major, lane-dense).

    lut_ref: (3*Dp, D*Dp)  rows = (channel, b_pad), cols = (g, r_pad), r fastest
    x_ref  : (3, T)        RGB on sublanes, T pixels on lanes
    o_ref  : (3, T)
    """
    D = dim
    Dp = dim_pad
    T = x_ref.shape[1]

    x = x_ref[...].astype(jnp.float32)                      # (3, T)

    # binsize matches the CUDA reference (1.000001 avoids the D-1 edge);
    # reciprocal multiply instead of three divisions.
    inv_binsize = jnp.float32((D - 1) / 1.000001)
    scaled = x * inv_binsize                                 # (3, T)
    idx_f = jnp.clip(jnp.floor(scaled), 0.0, D - 2)          # (3, T)
    idx = idx_f.astype(jnp.int32)                            # (3, T)
    frac = scaled - idx_f                                    # (3, T)

    r_id = idx[0:1, :]
    g_id = idx[1:2, :]
    b_id = idx[2:3, :]
    r_d = frac[0:1, :]
    g_d = frac[1:2, :]
    b_d = frac[2:3, :]

    # 2-tap one-hot weight vectors along each LUT axis.  Only rows < D can be
    # hot (indices are clipped to D-2), so the zero-padded LUT rows/cols never
    # contribute.
    rp_iota = jax.lax.broadcasted_iota(jnp.int32, (Dp, T), 0)
    g_iota = jax.lax.broadcasted_iota(jnp.int32, (D, T), 0)
    r_hot = (jnp.where(rp_iota == r_id, 1.0 - r_d, 0.0)
             + jnp.where(rp_iota == r_id + 1, r_d, 0.0))     # (Dp, T)
    g_hot = (jnp.where(g_iota == g_id, 1.0 - g_d, 0.0)
             + jnp.where(g_iota == g_id + 1, g_d, 0.0))      # (D, T)
    b_hot = (jnp.where(rp_iota == b_id, 1.0 - b_d, 0.0)
             + jnp.where(rp_iota == b_id + 1, b_d, 0.0))     # (Dp, T)

    # Separable (g, r)-plane weights: outer product of the two 2-tap one-hots.
    # Dp % 8 == 0, so the (D, Dp, T) -> (D*Dp, T) merge is sublane-aligned.
    gr_hot = (g_hot[:, None, :] * r_hot[None, :, :]).reshape(D * Dp, T)

    # Stage 1: contract the (g, r) plane against the LUT on the MXU.
    lut = lut_ref[...]                                       # (3*Dp, D*Dp) f32
    t1 = jnp.dot(lut, gr_hot,
                 preferred_element_type=jnp.float32,
                 precision=jax.lax.Precision.HIGHEST)        # (3*Dp, T)

    # Stage 2: 2-tap blend along the b axis, per channel (sublane-aligned
    # static slices; reduce goes to the XLU).  Rows written directly.
    for c in range(3):
        t1_c = t1[c * Dp:(c + 1) * Dp, :]                    # (Dp, T)
        out_c = jnp.sum(t1_c * b_hot, axis=0, keepdims=True)  # (1, T)
        o_ref[c:c + 1, :] = out_c.astype(o_ref.dtype)


def trilinear_interpolation(lut, x, *, tile=None):
    """lut: (3, D, D, D) laid out as lut[c, b, g, r]; x: (B, 3, H, W) in [0, 1].

    Returns (lut, output) like TrilinearInterpolationFunction.apply
    (lut is a pass-through)."""
    B, C, H, W = x.shape
    assert C == 3, "input must have 3 channels (RGB)"
    dim = lut.shape[-1]
    assert lut.shape == (3, dim, dim, dim)
    P = B * H * W

    # Pad the b and r LUT axes to a multiple of 8 so every in-kernel reshape /
    # static slice is sublane-aligned for any D.  Cast once here (not per tile).
    dp = _round_up(dim, 8)
    lut_f32 = lut.astype(jnp.float32)
    if dp != dim:
        lut_f32 = jnp.pad(lut_f32, ((0, 0), (0, dp - dim), (0, 0), (0, dp - dim)))
    lut_flat = lut_f32.reshape(3 * dp, dim * dp)   # rows=(c, b_pad), cols=(g, r_pad)

    # Channel-major, lane-dense pixel layout.
    x_flat = jnp.transpose(x, (1, 0, 2, 3)).reshape(3, P)
    p_aligned = _round_up(P, 128)

    # ---- D-dependent tile selection (VMEM- and megacore-aware) -------------
    if tile is None:
        budget = 16 * 1024 * 1024                  # ~16 MiB for the big temporaries
        per_px = 3 * 4 * dim * dp                  # gr_hot + broadcast temp + slack
        tile = max(256, min(8192, (budget // per_px) // 256 * 256))
    tile_eff = min(tile, p_aligned)
    if p_aligned >= 256:
        # give the "parallel" pixel axis >= 2 grid steps so both v7x cores work
        tile_eff = min(tile_eff, _round_up((p_aligned + 1) // 2, 128))
    tile_eff = max(tile_eff, 128)
    assert tile_eff % 128 == 0

    p_pad = _round_up(P, tile_eff)
    if p_pad != P:
        x_flat = jnp.pad(x_flat, ((0, 0), (0, p_pad - P)))   # zeros -> in-range ids
    grid = p_pad // tile_eff

    flops = 2 * (3 * dp) * (dim * dp) * p_pad + 16 * dim * dp * p_pad
    bytes_accessed = (x_flat.size + 3 * p_pad + lut_flat.size) * 4

    out_flat = pl.pallas_call(
        functools.partial(_trilinear_kernel, dim=dim, dim_pad=dp),
        out_shape=jax.ShapeDtypeStruct((3, p_pad), x.dtype),
        grid_spec=pltpu.PrefetchScalarGridSpec(
            num_scalar_prefetch=0,
            grid=(grid,),
            in_specs=[
                pl.BlockSpec((3 * dp, dim * dp), lambda i: (0, 0)),  # full LUT (resident)
                pl.BlockSpec((3, tile_eff), lambda i: (0, i)),        # pixel tile
            ],
            out_specs=pl.BlockSpec((3, tile_eff), lambda i: (0, i)),
        ),
        compiler_params=pltpu.CompilerParams(
            dimension_semantics=("parallel",),
            vmem_limit_bytes=32 * 1024 * 1024),
        cost_estimate=pl.CostEstimate(
            flops=int(flops), transcendentals=0, bytes_accessed=int(bytes_accessed)),
    )(lut_flat, x_flat)

    out = out_flat[:, :P].reshape(3, B, H, W).transpose(1, 0, 2, 3)
    return lut, out


def trilinear_reference(lut, x):
    """Pure-JAX reference of the CUDA TriLinearForward semantics."""
    dim = lut.shape[-1]
    binsize = 1.000001 / (dim - 1)
    lut_flat = lut.reshape(3, -1)
    B, C, H, W = x.shape
    xf = jnp.transpose(x, (0, 2, 3, 1)).reshape(-1, 3)
    r, g, b = xf[:, 0], xf[:, 1], xf[:, 2]
    r_sc, g_sc, b_sc = r / binsize, g / binsize, b / binsize
    rid = jnp.clip(jnp.floor(r_sc), 0, dim - 2).astype(jnp.int32)
    gid = jnp.clip(jnp.floor(g_sc), 0, dim - 2).astype(jnp.int32)
    bid = jnp.clip(jnp.floor(b_sc), 0, dim - 2).astype(jnp.int32)
    rd = r_sc - rid
    gd = g_sc - gid
    bd = b_sc - bid
    id000 = rid + gid * dim + bid * dim * dim

    def gat(idx):
        return lut_flat[:, idx]  # (3, P)

    out = ((1 - rd) * (1 - gd) * (1 - bd) * gat(id000)
           + rd * (1 - gd) * (1 - bd) * gat(id000 + 1)
           + (1 - rd) * gd * (1 - bd) * gat(id000 + dim)
           + rd * gd * (1 - bd) * gat(id000 + dim + 1)
           + (1 - rd) * (1 - gd) * bd * gat(id000 + dim * dim)
           + rd * (1 - gd) * bd * gat(id000 + dim * dim + 1)
           + (1 - rd) * gd * bd * gat(id000 + dim * dim + dim)
           + rd * gd * bd * gat(id000 + dim * dim + dim + 1))
    return out.T.reshape(B, H, W, 3).transpose(0, 3, 1, 2)


if __name__ == "__main__":
    key = jax.random.PRNGKey(0)
    dim = 8                      # LUT resolution (D^3 = 512 entries per channel)
    B, C, H, W = 2, 3, 16, 16

    # Deterministic parameter init: identity 3D LUT + small perturbation.
    grid = jnp.linspace(0.0, 1.0, dim)
    bgrid, ggrid, rgrid = jnp.meshgrid(grid, grid, grid, indexing="ij")
    lut_identity = jnp.stack([rgrid, ggrid, bgrid], axis=0)   # (3, D, D, D): lut[c, b, g, r]
    k_lut, k_x = jax.random.split(key)
    lut = (lut_identity
           + 0.05 * jax.random.normal(k_lut, lut_identity.shape, jnp.float32))
    x = jax.random.uniform(k_x, (B, C, H, W), jnp.float32)

    _, out = trilinear_interpolation(lut, x)
    out = jax.block_until_ready(out)

    ref = trilinear_reference(lut, x)
    assert out.shape == x.shape and out.dtype == x.dtype
    np.testing.assert_allclose(np.asarray(out), np.asarray(ref), rtol=1e-4, atol=1e-4)
    print("KERNEL_OK")
</pallas_src>

<mosaic_0001>
module attributes {stable_mosaic.version = 11 : i64} {
  func.func @_trilinear_kernel(%arg0: i32, %arg1: memref<24x64xf32, #tpu.memory_space<vmem>>, %arg2: memref<3x256xf32, #tpu.memory_space<vmem>>, %arg3: memref<3x256xf32, #tpu.memory_space<vmem>>) attributes {dimension_semantics = [#tpu.dimension_semantics<parallel>], iteration_bounds = array<i64: 2>, scalar_prefetch = 0 : i64, scratch_operands = 0 : i64, tpu.core_type = #tpu.core_type<tc>, window_params = [{pipeline_mode = #tpu.pipeline_mode<synchronous>, transform_indices = @transform_0, window_bounds = array<i64: 24, 64>}, {transform_indices = @transform_1, window_bounds = array<i64: 3, 256>}, {transform_indices = @transform_2, window_bounds = array<i64: 3, 256>}]} {
    %c0 = arith.constant 0 : index
    %c0_0 = arith.constant 0 : index
    %0 = vector.load %arg2[%c0, %c0_0] : memref<3x256xf32, #tpu.memory_space<vmem>>, vector<3x256xf32>
    %cst = arith.constant 6.99999285 : f32
    %1 = vector.broadcast %cst : f32 to vector<3x256xf32>
    %2 = arith.mulf %0, %1 : vector<3x256xf32>
    %3 = math.floor %2 : vector<3x256xf32>
    %cst_1 = arith.constant 0.000000e+00 : f32
    %c6_i32 = arith.constant 6 : i32
    %4 = vector.broadcast %cst_1 : f32 to vector<3x256xf32>
    %5 = arith.maximumf %4, %3 : vector<3x256xf32>
    %6 = arith.sitofp %c6_i32 : i32 to f32
    %7 = vector.broadcast %6 : f32 to vector<3x256xf32>
    %8 = arith.minimumf %7, %5 : vector<3x256xf32>
    %9 = arith.fptosi %8 : vector<3x256xf32> to vector<3x256xi32>
    %10 = arith.subf %2, %8 : vector<3x256xf32>
    %11 = vector.extract_strided_slice %9 {offsets = [0, 0], sizes = [1, 256], strides = [1, 1]} : vector<3x256xi32> to vector<1x256xi32>
    %12 = vector.extract_strided_slice %9 {offsets = [1, 0], sizes = [1, 256], strides = [1, 1]} : vector<3x256xi32> to vector<1x256xi32>
    %13 = vector.extract_strided_slice %9 {offsets = [2, 0], sizes = [1, 256], strides = [1, 1]} : vector<3x256xi32> to vector<1x256xi32>
    %14 = vector.extract_strided_slice %10 {offsets = [0, 0], sizes = [1, 256], strides = [1, 1]} : vector<3x256xf32> to vector<1x256xf32>
    %15 = vector.extract_strided_slice %10 {offsets = [1, 0], sizes = [1, 256], strides = [1, 1]} : vector<3x256xf32> to vector<1x256xf32>
    %16 = vector.extract_strided_slice %10 {offsets = [2, 0], sizes = [1, 256], strides = [1, 1]} : vector<3x256xf32> to vector<1x256xf32>
    %17 = tpu.iota {dimensions = array<i32: 0>} : vector<8x256xi32>
    %18 = tpu.iota {dimensions = array<i32: 0>} : vector<8x256xi32>
    %19 = vector.broadcast %11 : vector<1x256xi32> to vector<8x256xi32>
    %20 = arith.cmpi eq, %17, %19 : vector<8x256xi32>
    %cst_2 = arith.constant 1.000000e+00 : f32
    %21 = vector.broadcast %cst_2 : f32 to vector<1x256xf32>
    %22 = arith.subf %21, %14 : vector<1x256xf32>
    %cst_3 = arith.constant 0.000000e+00 : f32
    %23 = vector.shape_cast %22 : vector<1x256xf32> to vector<1x256xf32>
    %24 = vector.broadcast %23 : vector<1x256xf32> to vector<8x256xf32>
    %25 = vector.broadcast %cst_3 : f32 to vector<8x256xf32>
    %26 = arith.select %20, %24, %25 : vector<8x256xi1>, vector<8x256xf32>
    %c1_i32 = arith.constant 1 : i32
    %27 = vector.broadcast %c1_i32 : i32 to vector<1x256xi32>
    %28 = arith.addi %11, %27 : vector<1x256xi32>
    %29 = vector.broadcast %28 : vector<1x256xi32> to vector<8x256xi32>
    %30 = arith.cmpi eq, %17, %29 : vector<8x256xi32>
    %cst_4 = arith.constant 0.000000e+00 : f32
    %31 = vector.shape_cast %14 : vector<1x256xf32> to vector<1x256xf32>
    %32 = vector.broadcast %31 : vector<1x256xf32> to vector<8x256xf32>
    %33 = vector.broadcast %cst_4 : f32 to vector<8x256xf32>
    %34 = arith.select %30, %32, %33 : vector<8x256xi1>, vector<8x256xf32>
    %35 = arith.addf %26, %34 : vector<8x256xf32>
    %36 = vector.broadcast %12 : vector<1x256xi32> to vector<8x256xi32>
    %37 = arith.cmpi eq, %18, %36 : vector<8x256xi32>
    %cst_5 = arith.constant 1.000000e+00 : f32
    %38 = vector.broadcast %cst_5 : f32 to vector<1x256xf32>
    %39 = arith.subf %38, %15 : vector<1x256xf32>
    %cst_6 = arith.constant 0.000000e+00 : f32
    %40 = vector.shape_cast %39 : vector<1x256xf32> to vector<1x256xf32>
    %41 = vector.broadcast %40 : vector<1x256xf32> to vector<8x256xf32>
    %42 = vector.broadcast %cst_6 : f32 to vector<8x256xf32>
    %43 = arith.select %37, %41, %42 : vector<8x256xi1>, vector<8x256xf32>
    %c1_i32_7 = arith.constant 1 : i32
    %44 = vector.broadcast %c1_i32_7 : i32 to vector<1x256xi32>
    %45 = arith.addi %12, %44 : vector<1x256xi32>
    %46 = vector.broadcast %45 : vector<1x256xi32> to vector<8x256xi32>
    %47 = arith.cmpi eq, %18, %46 : vector<8x256xi32>
    %cst_8 = arith.constant 0.000000e+00 : f32
    %48 = vector.shape_cast %15 : vector<1x256xf32> to vector<1x256xf32>
    %49 = vector.broadcast %48 : vector<1x256xf32> to vector<8x256xf32>
    %50 = vector.broadcast %cst_8 : f32 to vector<8x256xf32>
    %51 = arith.select %47, %49, %50 : vector<8x256xi1>, vector<8x256xf32>
    %52 = arith.addf %43, %51 : vector<8x256xf32>
    %53 = vector.broadcast %13 : vector<1x256xi32> to vector<8x256xi32>
    %54 = arith.cmpi eq, %17, %53 : vector<8x256xi32>
    %cst_9 = arith.constant 1.000000e+00 : f32
    %55 = vector.broadcast %cst_9 : f32 to vector<1x256xf32>
    %56 = arith.subf %55, %16 : vector<1x256xf32>
    %cst_10 = arith.constant 0.000000e+00 : f32
    %57 = vector.shape_cast %56 : vector<1x256xf32> to vector<1x256xf32>
    %58 = vector.broadcast %57 : vector<1x256xf32> to vector<8x256xf32>
    %59 = vector.broadcast %cst_10 : f32 to vector<8x256xf32>
    %60 = arith.select %54, %58, %59 : vector<8x256xi1>, vector<8x256xf32>
    %c1_i32_11 = arith.constant 1 : i32
    %61 = vector.broadcast %c1_i32_11 : i32 to vector<1x256xi32>
    %62 = arith.addi %13, %61 : vector<1x256xi32>
    %63 = vector.broadcast %62 : vector<1x256xi32> to vector<8x256xi32>
    %64 = arith.cmpi eq, %17, %63 : vector<8x256xi32>
    %cst_12 = arith.constant 0.000000e+00 : f32
    %65 = vector.shape_cast %16 : vector<1x256xf32> to vector<1x256xf32>
    %66 = vector.broadcast %65 : vector<1x256xf32> to vector<8x256xf32>
    %67 = vector.broadcast %cst_12 : f32 to vector<8x256xf32>
    %68 = arith.select %64, %66, %67 : vector<8x256xi1>, vector<8x256xf32>
    %69 = arith.addf %60, %68 : vector<8x256xf32>
    %70 = vector.shape_cast %52 : vector<8x256xf32> to vector<8x1x256xf32>
    %71 = vector.shape_cast %35 : vector<8x256xf32> to vector<1x8x256xf32>
    %72 = vector.broadcast %70 : vector<8x1x256xf32> to vector<8x8x256xf32>
    %73 = vector.broadcast %71 : vector<1x8x256xf32> to vector<8x8x256xf32>
    %74 = arith.mulf %72, %73 : vector<8x8x256xf32>
    %75 = vector.shape_cast %74 : vector<8x8x256xf32> to vector<64x256xf32>
    %c0_13 = arith.constant 0 : index
    %c0_14 = arith.constant 0 : index
    %76 = vector.load %arg1[%c0_13, %c0_14] : memref<24x64xf32, #tpu.memory_space<vmem>>, vector<24x64xf32>
    %cst_15 = arith.constant dense<0.000000e+00> : vector<24x256xf32>
    %77 = tpu.matmul %76, %75, %cst_15 {dimension_numbers = #tpu.dot_dimension_numbers<[1], [0], [0], [1], [0, 0, 1, 1], [], []>, precision = #tpu.contract_precision<fp32>} : vector<24x64xf32>, vector<64x256xf32>, vector<24x256xf32> -> vector<24x256xf32>
    %78 = vector.extract_strided_slice %77 {offsets = [0, 0], sizes = [8, 256], strides = [1, 1]} : vector<24x256xf32> to vector<8x256xf32>
    %79 = arith.mulf %78, %69 : vector<8x256xf32>
    %cst_16 = arith.constant dense<0.000000e+00> : vector<256xf32>
    %80 = vector.multi_reduction <add>, %79, %cst_16 [0] : vector<8x256xf32> to vector<256xf32>
    %81 = vector.shape_cast %80 : vector<256xf32> to vector<1x256xf32>
    %c0_17 = arith.constant 0 : index
    %c0_18 = arith.constant 0 : index
    %82 = vector.load %arg3[%c0_17, %c0_18] : memref<3x256xf32, #tpu.memory_space<vmem>>, vector<1x256xf32>
    tpu.vector_store %arg3[%c0_17, %c0_18], %81 {strides = array<i32>} : memref<3x256xf32, #tpu.memory_space<vmem>>, vector<1x256xf32>,
    %83 = vector.extract_strided_slice %77 {offsets = [8, 0], sizes = [8, 256], strides = [1, 1]} : vector<24x256xf32> to vector<8x256xf32>
    %84 = arith.mulf %83, %69 : vector<8x256xf32>
    %cst_19 = arith.constant dense<0.000000e+00> : vector<256xf32>
    %85 = vector.multi_reduction <add>, %84, %cst_19 [0] : vector<8x256xf32> to vector<256xf32>
    %86 = vector.shape_cast %85 : vector<256xf32> to vector<1x256xf32>
    %c1 = arith.constant 1 : index
    %c0_20 = arith.constant 0 : index
    %87 = vector.load %arg3[%c1, %c0_20] : memref<3x256xf32, #tpu.memory_space<vmem>>, vector<1x256xf32>
    tpu.vector_store %arg3[%c1, %c0_20], %86 {strides = array<i32>} : memref<3x256xf32, #tpu.memory_space<vmem>>, vector<1x256xf32>,
    %88 = vector.extract_strided_slice %77 {offsets = [16, 0], sizes = [8, 256], strides = [1, 1]} : vector<24x256xf32> to vector<8x256xf32>
    %89 = arith.mulf %88, %69 : vector<8x256xf32>
    %cst_21 = arith.constant dense<0.000000e+00> : vector<256xf32>
    %90 = vector.multi_reduction <add>, %89, %cst_21 [0] : vector<8x256xf32> to vector<256xf32>
    %91 = vector.shape_cast %90 : vector<256xf32> to vector<1x256xf32>
    %c2 = arith.constant 2 : index
    %c0_22 = arith.constant 0 : index
    %92 = vector.load %arg3[%c2, %c0_22] : memref<3x256xf32, #tpu.memory_space<vmem>>, vector<1x256xf32>
    tpu.vector_store %arg3[%c2, %c0_22], %91 {strides = array<i32>} : memref<3x256xf32, #tpu.memory_space<vmem>>, vector<1x256xf32>,
    return
  }
  func.func @transform_0(%arg0: i32) -> (i32, i32) {
    %c0_i32 = arith.constant 0 : i32
    %c0_i32_0 = arith.constant 0 : i32
    %c0_i32_1 = arith.constant 0 : i32
    return %c0_i32, %c0_i32_0 : i32, i32
  }
  func.func @transform_1(%arg0: i32) -> (i32, i32) {
    %c0_i32 = arith.constant 0 : i32
    %c0_i32_0 = arith.constant 0 : i32
    return %c0_i32, %arg0 : i32, i32
  }
  func.func @transform_2(%arg0: i32) -> (i32, i32) {
    %c0_i32 = arith.constant 0 : i32
    %c0_i32_0 = arith.constant 0 : i32
    return %c0_i32, %arg0 : i32, i32
  }
}

</mosaic_0001>

<bundles_post_ra>
// kernel: tpu_custom_call.1
= control target key start
LH: loop header
LB: loop body
LE: loop exit
PB: predicated region body
PF: predicated region fallthrough
CT: control target
= control target key end

     0   :  { %7 = vsyncpa [#allocation3], 0  ;;  %s2440_s0 = inlined_call_operand.hbm [shape: f32[24,64], index: 0, kind: input, shape index: {}]   ;;  %s2441_s1 = inlined_call_operand.hbm [shape: f32[3,512], index: 1, kind: input, shape index: {}]   ;;  %s2442_s2 = inlined_call_operand.hbm [shape: f32[3,512], index: 2, kind: output, shape index: {}]  }
   0x1   :  { %8 = vsyncpa [#allocation6], 0 }
   0x2   :  { %10 = vsyncpa [#allocation6 + $0x1], 0 }
   0x3   :  { %11 = vsyncpa [#allocation4], 0 }
   0x4   :  { %13 = vsyncpa [#allocation4 + $0x1], 0  ;;  %s1893_s9 = smov 0   ;;  %s1895_s10 = smov 0  }
   0x5   :  { %s1897_s11 = smov 0   ;;  %s1899_s12 = smov 0  }
   0x6 LB: > { %s1914_s13 = sadd.s32 4294967295, %s1869_s12   ;;  %s1532_s14 = sadd.s32 4294967294, %s1869_s12   ;;  %s1869_s12 = sphi %s1899_s12, %s2471_s12   ;;  %s1865_s11 = sphi %s1897_s11, %s2470_s11   ;;  %s1861_s10 = sphi %s1895_s10, %s2469_s10   ;;  %s1857_s9 = sphi %s1893_s9, %s2468_s9  }
   0x7   : > { %p60_p0 = scmp.ne.s32.totalorder %s1861_s10, %s1857_s9  ;;  %p2443_p1 = scmp.eq.s32.totalorder %s1914_s13, 0 }
   0x8   : > { %p90_p3 = scmp.eq.s32.totalorder %s1532_s14, 1  ;;  %p1533_p5 = scmp.ge.s32.totalorder %s1869_s12, 1 }
   0x9   : > { %p1923_p4 = por %p2443_p1, %p60_p0  ;;  %p97_p7 = scmp.lt.s32.totalorder %s1869_s12, 3 }
   0xa   : > { %p1928_p6 = por %p90_p3, %p60_p0  ;;  %s1871_s18 = smov [#allocation2]  }
   0xb   : > { %s2449_s15 = scalar_select %p1923_p4, 1, 0 }
   0xc   : > { %s2450_s16 = scalar_select %p1928_p6, 1, 0 }
   0xd   : > { %p1933_p8 = pnand %p1533_p5, %p97_p7  ;;  %s109_s19 = sshll.u32 %s1871_s18, 4  ;;  %s1937_s19 = int_to_ptr.vmem [resolvable:$true] %s109_s19 }
   0xe   : > { %s1949_s21 = sadd.s32 1, %s1869_s12   ;;  %s47_s22 = sadd.s32 1, %s1865_s11 }
   0xf   : > { %s2451_s17 = scalar_select %p1933_p8, 1, 0 }
  0x10   : > { %p1688_p9 = pneg %p1933_p8  ;;  %s44_s23 = ssub.s32 %s1869_s12, %s1949_s21 }
  0x11   : > { %s1741_s26 = scalar_lea.hbm %s2440_s0, 384 }
  0x12   : > { %p1944_p11 = pnand %p1688_p9, %p2443_p1  ;;  %p1742_p12 = scmp.ne.s32.totalorder %s2440_s0, %s1741_s26 }
  0x13   : > { %p1748_p5 = scmp.lt.u32.totalorder %s1741_s26, %s2440_s0 }
  0x14   : > { %p1743_p13 = pneg %p1944_p11 }
  0x16   : > { %p1744_p0 = pnand %p1743_p13, %p1742_p12 }
  0x18   : > { %p1745_p3 = pneg %p1744_p0 }
  0x1a   : > { %p1750_p7 = pnand %p1748_p5, %p1745_p3 }
  0x1c   : > { %1753 = shalt.err (!%p1750_p7)
}
  0x1d   : > { %s1754_s3 = scalar_lea.vmem %s1937_s19, 384  ;;  %p1762_p2 = scmp.lt.s32.totalorder %s1937_s19, %s1937_s19 }
  0x1e   : > { %p1755_p9 = scmp.ne.s32.totalorder %s1937_s19, %s1754_s3  ;;  %p1763_p6 = scmp.lt.s32.totalorder %s1754_s3, %s1754_s3 }
  0x20   : > { %p1757_p10 = pnand %p1755_p9, %p1743_p13  ;;  %p1764_p4 = por %p1763_p6, %p1762_p2 }
  0x22   : > { %p1758_p1 = pneg %p1757_p10 }
  0x24   : > { %p1765_p8 = pnand %p1764_p4, %p1758_p1 }
  0x26   : > { %1768 = shalt.err (!%p1765_p8)
}
  0x27   : > { %s1872_s4 = smov 128   ;;  %s1873_s5 = smov 8  }
  0x28   : > { %1691 = dma.hbm_to_vmem [thread:$0]  (!%p1944_p11), %s2440_s0, 384, %s1937_s19, [#allocation3], %s1872_s4, %s1872_s4, %s1873_s5  }
  0x29   : > { %p45_p2 = scmp.eq.s32.totalorder %s44_s23, 0  ;;  %p54_p1 = scmp.ne.s32.totalorder %s1865_s11, %s1861_s10 }
  0x2a   : > { %p55_p4 = scmp.eq.s32.totalorder %s1869_s12, 0  ;;  %p1701_p6 = scmp.lt.s32.totalorder %s1869_s12, 2 }
  0x2b   : > { %s1980_s8 = scalar_select %p45_p2, %s1865_s11, %s47_s22  }
  0x2c   : > { %p56_p8 = por %p55_p4, %p54_p1  ;;  %p2453_p10 = scmp.eq.s32.totalorder %s1914_s13, 1 }
  0x2d   : > { %s123_s18 = sand.u32 1, %s1865_s11   ;;  %s1550_s24 = sshll.u32 %s1869_s12, 7 }
  0x2e   : > { %p1984_p12 = por %p2453_p10, %p54_p1  ;;  %s1536_s25 = sshll.u32 %s123_s18, 3 }
  0x2f   : > { %s1993_s27 = scalar_lea.hbm %s2441_s1, %s1550_s24  ;;  %s127_s19 = scalar_lea.vmem [#allocation5], %s1536_s25 }
  0x30   : > { %s135_s22 = sshll.u32 %s127_s19, 4  ;;  %p1995_p11 = pnand %p1701_p6, %p56_p8  ;;  %s1999_s22 = int_to_ptr.vmem [resolvable:$true] %s135_s22 }
  0x31   : > { %s124_s28 = scalar_lea.sflag [#allocation6], %s123_s18  ;;  %s1769_s29 = scalar_lea.hbm %s1993_s27, 128 }
  0x32   : > { %p1770_p13 = scmp.ne.s32.totalorder %s1993_s27, %s1769_s29  ;;  %p1771_p0 = pneg %p1995_p11 }
  0x33   : > { %s1774_s4 = scalar_lea.hbm %s2441_s1, 256  ;;  %p1775_p7 = scmp.lt.u32.totalorder %s1993_s27, %s2441_s1 }
  0x34   : > { %p1772_p3 = pnand %p1771_p0, %p1770_p13  ;;  %p1776_p9 = scmp.lt.u32.totalorder %s1774_s4, %s1769_s29 }
  0x35   : > { %p1778_p1 = scmp.lt.u32.totalorder %s1769_s29, %s1993_s27 }
  0x36   : > { %p1773_p5 = pneg %p1772_p3  ;;  %p1777_p2 = por %p1776_p9, %p1775_p7 }
  0x38   : > { %p1779_p4 = por %p1778_p1, %p1777_p2 }
  0x3a   : > { %p1780_p6 = pnand %p1779_p4, %p1773_p5 }
  0x3c   : > { %1783 = shalt.err (!%p1780_p6)
}
  0x3d   : > { %s1784_s7 = scalar_lea.vmem %s1999_s22, 128  ;;  %s1874_s18 = smov [#allocation5]  }
  0x3e   : > { %p1785_p8 = scmp.ne.s32.totalorder %s1999_s22, %s1784_s7  ;;  %s1789_s24 = sshll.u32 %s1874_s18, 4  ;;  %s1790_s24 = int_to_ptr.vmem [resolvable:$false] %s1789_s24 }
  0x3f   : > { %s1791_s25 = scalar_lea.vmem %s1790_s24, 256  ;;  %p1792_p3 = scmp.lt.s32.totalorder %s1999_s22, %s1790_s24 }
  0x40   : > { %p1787_p10 = pnand %p1785_p8, %p1771_p0  ;;  %p1793_p7 = scmp.lt.s32.totalorder %s1791_s25, %s1784_s7 }
  0x42   : > { %p1788_p13 = pneg %p1787_p10  ;;  %p1794_p9 = por %p1793_p7, %p1792_p3 }
  0x44   : > { %p1795_p2 = pnand %p1794_p9, %p1788_p13 }
  0x46   : > { %1798 = shalt.err (!%p1795_p2)
}
  0x47   : > { %1695 = dma.hbm_to_vmem [thread:$0]  (!%p1995_p11), %s1993_s27, 128, %s1999_s22, %s124_s28  }
  0x48   : > { %p2456_p5 = scmp.ne.s32.totalorder %s2451_s17, 0 }
  0x49   : > { %p2457_p0 = scmp.eq.s32.totalorder (!%p2456_p5), %s1914_s13, 0 }
  0x4a   : > { %144 = sbr.rel (%p2456_p5) target bundleno = 434 (0x1b2), region = 28 }
  0x51   : > { %1844 = dma.done.wait (%p2457_p0), [#allocation3], 384   ;;  %p2458_p1 = pmov %p2457_p0 }
  0x52   : > { %s2033_s20 = sand.u32 1, %s1861_s10   ;;  %p2459_p11 = scmp.ne.s32.totalorder %s2449_s15, 0 }
  0x53   : > { %1846 = vsyncadd (%p2458_p1), [#allocation3], 4294966912  ;;  %s1541_s26 = sshll.u32 %s2033_s20, 3  ;;  %s151_s19 = scalar_lea.sflag [#allocation6], %s2033_s20 }
  0x54   : > { %s154_s27 = scalar_lea.vmem [#allocation5], %s1541_s26 }
  0x55   : > { %1848 = dma.done.wait (%p2459_p11), %s151_s19, 128  }
  0x56   : > { %1850 = vsyncadd (%p2459_p11), %s151_s19, 4294967168  ;;  %v1875_v0 = vmov 0.0   ;;  %vm575_vm0 = vcmask 523264   ;;  %v177_v1 = vld [vmem:[%s154_s27] sm:$0x77]  ;;  %v573_v3 = vld [vmem:[#allocation2 + $0x8] sm:$0xff]  ;;  %v2446_v5 = vlaneseq }
  0x57   : > { %665 = vmatprep.mubr.f32.mxu1 %v1875_v0  ;;  %1066 = vmatprep.mubr.f32.mxu0 %v1875_v0  ;;  %v572_v2 = vld [vmem:[#allocation2] sm:$0xff]  ;;  %v178_v4 = vmul.f32 6.999993, %v177_v1  ;;  %v580_v7 = vsel %vm575_vm0, %v573_v3, 0  ;;  %v574_v8 = vld [vmem:[#allocation2 + $0x10] sm:$0xff]  ;;  %s174_s15 = scalar_lea.vmem [#allocation7], %s1541_s26 }
  0x58   : > { %v577_v6 = vsel %vm575_vm0, %v572_v2, 0  ;;  %v2047_v11 = vand.u32 4294901760, %v580_v7  ;;  %v2050_v13 = vshrl.u32 %v2446_v5, 7  ;;  %v583_v14 = vsel %vm575_vm0, %v574_v8, 0  ;;  %s1551_s17 = sshll.u32 %s1914_s13, 7  ;;  %s1450_s22 = sshll.u32 %s174_s15, 4  ;;  %s2396_s22 = int_to_ptr.vmem [resolvable:$true] %s1450_s22 }
  0x59   : > { %v179_v9 = vfloor.f32 %v178_v4  ;;  %v2045_v10 = vand.u32 4294901760, %v577_v6  ;;  %v1876_v16 = vmov 1966171168   ;;  %v2059_v21 = vand.u32 4294901760, %v583_v14  ;;  %s2394_s29 = scalar_lea.hbm %s2442_s2, %s1551_s17  ;;  %s1436_s13 = scalar_lea.sflag [#allocation4], %s2033_s20 }
  0x5a   : > { %v429_v17 = vunpack.c.l.s4 %v1876_v16  ;;  %v192_v18 = vsub.s32 4, %v2050_v13  ;;  %v2057_v20 = vsub.f32 %v580_v7, %v2047_v11  ;;  %v2064_v24 = vsub.s32 1, %v2050_v13  ;;  %s1799_s30 = scalar_lea.vmem %s2396_s22, 128  ;;  %s1877_s3 = smov [#allocation7]  }
  0x5b   : > { %v180_v12 = vmax.f32 %v179_v9, 0.0  ;;  %v2054_v19 = vsub.f32 %v577_v6, %v2045_v10  ;;  %v274_v25 = vsub.s32 5, %v2050_v13  ;;  %v2070_v27 = vsub.s32 0, %v2050_v13  ;;  %p1800_p4 = scmp.ne.s32.totalorder %s2396_s22, %s1799_s30  ;;  %s1803_s4 = sshll.u32 %s1877_s3, 4  ;;  %s1804_s4 = int_to_ptr.vmem [resolvable:$false] %s1803_s4 }
  0x5c   : > { %v430_v29 = vunpack.c.0.s8 %v429_v17  ;;  %v2448_v32 = vand.u32 4294901760, %v2057_v20  ;;  %v2079_v33 = vsub.f32 %v583_v14, %v2059_v21  ;;  %s1805_s5 = scalar_lea.vmem %s1804_s4, 256  ;;  %p1806_p10 = scmp.lt.s32.totalorder %s2396_s22, %s1804_s4 }
  0x5d   : > { %v181_v15 = vmin.f32 %v180_v12, 6.0  ;;  %v668_v31 = vand.u32 4294901760, %v2054_v19  ;;  %p1801_p6 = pnand %p1800_p4, %p1984_p12  ;;  %p1807_p13 = scmp.lt.s32.totalorder %s1805_s5, %s1799_s30 }
  0x5e   : > { %v2127_v7 = vsub.s32 %v430_v29, %v2050_v13  ;;  %v2447_v29 = vand.u32 4294901760, %v2079_v33 }
  0x5f   : > { %v1678_v22 = vtrunc.f32 %v181_v15  ;;  %v2061_v23 = vsub.f32 %v178_v4, %v181_v15  ;;  %p1802_p8 = pneg %p1801_p6  ;;  %p1808_p3 = por %p1807_p13, %p1806_p10 }
  0x61   : > { %v2067_v26 = vcvt.f32.s32 %v1678_v22  ;;  %v2073_v28 = vsub.f32 1.0, %v2061_v23  ;;  %v253_v30 = vrot.slane %v2061_v23, %v192_v18  ;;  %v327_v36 = vrot.slane %v2061_v23, %v2064_v24  ;;  %p1809_p7 = pnand %p1808_p3, %p1802_p8 }
  0x62   : > { %v331_v37 = vrot.slane %v2061_v23, %v274_v25  ;;  %v249_v53 = vrot.slane %v2061_v23, %v2070_v27  ;;  %v2139_v22 = vsub.f32 %v2054_v19, %v668_v31 }
  0x63   : > { %v193_v34 = vrot.slane %v2067_v26, %v192_v18  ;;  %v2083_v35 = vadd.s32 1, %v2067_v26  ;;  %v271_v38 = vrot.slane %v2067_v26, %v2064_v24  ;;  %v275_v39 = vrot.slane %v2067_v26, %v274_v25 }
  0x64   : > { %v289_v40 = vrot.slane %v2073_v28, %v2064_v24  ;;  %v293_v41 = vrot.slane %v2073_v28, %v274_v25  ;;  %v213_v43 = vrot.slane %v2073_v28, %v192_v18  ;;  %v263_v54 = vrot.slane %v253_v30, %v2070_v27 }
  0x65   : > { %v201_v42 = vrot.slane %v193_v34, %v2070_v27  ;;  %v234_v44 = vrot.slane %v2083_v35, %v192_v18  ;;  %v309_v45 = vrot.slane %v2083_v35, %v2064_v24  ;;  %v279_v46 = vrot.slane %v271_v38, %v2064_v24 }
  0x66   : > { %v283_v47 = vrot.slane %v275_v39, %v2064_v24  ;;  %v299_v48 = vrot.slane %v289_v40, %v2064_v24  ;;  %v303_v49 = vrot.slane %v293_v41, %v2064_v24  ;;  %v313_v51 = vrot.slane %v2083_v35, %v274_v25 }
  0x67   : > { %v242_v50 = vrot.slane %v234_v44, %v2070_v27  ;;  %v317_v52 = vrot.slane %v309_v45, %v2064_v24  ;;  %vm284_vm1 = vcmp.eq.s32.totalorder %v2050_v13, %v279_v46  ;;  %v337_v55 = vrot.slane %v327_v36, %v2064_v24 }
  0x68   : > { %vm285_vm2 = vcmp.eq.s32.totalorder %v2050_v13, %v283_v47  ;;  %vm203_vm3 = vcmp.eq.s32.totalorder %v2050_v13, %v201_v42  ;;  %v223_v56 = vrot.slane %v213_v43, %v2070_v27  ;;  %v304_v57 = vsel %vm284_vm1, %v299_v48, 0.0 }
  0x69   : > { %v321_v58 = vrot.slane %v313_v51, %v2064_v24  ;;  %v305_v59 = vsel %vm285_vm2, %v303_v49, 0.0  ;;  %vm322_vm4 = vcmp.eq.s32.totalorder %v2050_v13, %v317_v52  ;;  %v341_v60 = vrot.slane %v331_v37, %v2064_v24 }
  0x6a   : > { %v189_v61 = vrot.slane %v2067_v26, %v2070_v27  ;;  %vm244_vm5 = vcmp.eq.s32.totalorder %v2050_v13, %v242_v50  ;;  %v342_v62 = vsel %vm322_vm4, %v337_v55, 0.0  ;;  %v209_v63 = vrot.slane %v2073_v28, %v2070_v27 }
  0x6b   : > { %vm323_vm6 = vcmp.eq.s32.totalorder %v2050_v13, %v321_v58  ;;  %v344_v2 = vadd.f32 %v342_v62, %v304_v57  ;;  %v230_v4 = vrot.slane %v2083_v35, %v2070_v27  ;;  %v259_v9 = vrot.slane %v249_v53, %v2070_v27 }
  0x6c   : > { %v343_v1 = vsel %vm323_vm6, %v341_v60, 0.0  ;;  %v197_v3 = vrot.slane %v189_v61, %v2070_v27  ;;  %v219_v8 = vrot.slane %v209_v63, %v2070_v27  ;;  %v225_v12 = vsel %vm203_vm3, %v223_v56, 0.0 }
  0x6d   : > { %v345_v6 = vadd.f32 %v343_v1, %v305_v59  ;;  %v238_v14 = vrot.slane %v230_v4, %v2070_v27  ;;  %v265_v15 = vsel %vm244_vm5, %v263_v54, 0.0  ;;  %v2144_v25 = vsub.f32 %v2057_v20, %v2448_v32 }
  0x6e   : > { %vm202_vm7 = vcmp.eq.s32.totalorder %v2050_v13, %v197_v3  ;;  %v2149_v37 = vadd.f32 %v265_v15, %v225_v12  ;;  %v670_v43 = vand.u32 4294901760, %v2139_v22  ;;  %v2160_v45 = vsub.f32 %v2079_v33, %v2447_v29 }
  0x6f   : > { %v426_v16 = vcombine.low %v344_v2, %v345_v6  ;;  %v224_v17 = vsel %vm202_vm7, %v219_v8, 0.0  ;;  %v427_v18 = vcombine.high %v344_v2, %v345_v6  ;;  %vm243_vm8 = vcmp.eq.s32.totalorder %v2050_v13, %v238_v14 }
  0x70   : > { %v264_v34 = vsel %vm243_vm8, %v259_v9, 0.0 }
  0x71   : > { %v434_v30 = vrot.slane %v426_v16, %v2127_v7  ;;  %v441_v36 = vrot.slane %v427_v18, %v2127_v7  ;;  %v2151_v38 = vadd.f32 %v264_v34, %v224_v17 }
  0x73   : > { %v442_v39 = vcombine.high %v434_v30, %v434_v30  ;;  %v450_v40 = vrot.slane %v434_v30, %v2127_v7  ;;  %v443_v41 = vcombine.high %v441_v36, %v441_v36  ;;  %v457_v42 = vrot.slane %v441_v36, %v2127_v7 }
  0x75   : > { %v464_v46 = vrot.slane %v442_v39, %v2127_v7  ;;  %v483_v47 = vrot.slane %v450_v40, %v2064_v24  ;;  %v479_v48 = vrot.slane %v450_v40, %v2070_v27  ;;  %v472_v49 = vcombine.high %v450_v40, %v450_v40 }
  0x76   : > { %v471_v50 = vrot.slane %v443_v41, %v2127_v7  ;;  %v515_v51 = vrot.slane %v457_v42, %v2064_v24  ;;  %v511_v52 = vrot.slane %v457_v42, %v2070_v27  ;;  %v2168_v53 = vcombine.high %v457_v42, %v457_v42 }
  0x77   : > { %v491_v54 = vrot.slane %v464_v46, %v2064_v24  ;;  %v557_v55 = vmul.f32 %v483_v47, %v2149_v37  ;;  %v487_v56 = vrot.slane %v464_v46, %v2070_v27  ;;  %v556_v57 = vmul.f32 %v479_v48, %v2151_v38 }
  0x78   : > { %v474_v58 = vcombine.high %v464_v46, %v464_v46  ;;  %v499_v59 = vrot.slane %v472_v49, %v2064_v24  ;;  %v495_v60 = vrot.slane %v472_v49, %v2070_v27  ;;  %v523_v61 = vrot.slane %v471_v50, %v2064_v24 }
  0x79   : > { %v559_v62 = vmul.f32 %v491_v54, %v2149_v37  ;;  %v585_v63 = vand.u32 4294901760, %v557_v55  ;;  %v558_v1 = vmul.f32 %v487_v56, %v2151_v38  ;;  %v587_v2 = vand.u32 4294901760, %v556_v57 }
  0x7a   : > { %v507_v3 = vrot.slane %v474_v58, %v2064_v24  ;;  %v561_v4 = vmul.f32 %v499_v59, %v2149_v37  ;;  %v503_v6 = vrot.slane %v474_v58, %v2070_v27  ;;  %v560_v8 = vmul.f32 %v495_v60, %v2151_v38 }
  0x7b   : > { %v589_v9 = vand.u32 4294901760, %v559_v62  ;;  %v2183_v12 = vsub.f32 %v557_v55, %v585_v63  ;;  %v591_v14 = vand.u32 4294901760, %v558_v1  ;;  %v2185_v15 = vsub.f32 %v556_v57, %v587_v2 }
  0x7c   : > { %v563_v16 = vmul.f32 %v507_v3, %v2149_v37  ;;  %v593_v17 = vand.u32 4294901760, %v561_v4  ;;  %v562_v18 = vmul.f32 %v503_v6, %v2151_v38  ;;  %v595_v30 = vand.u32 4294901760, %v560_v8 }
  0x7d   : > { %v2189_v34 = vpack.c.bf16 %v589_v9, %v585_v63  ;;  %v2191_v36 = vsub.f32 %v559_v62, %v589_v9  ;;  %v2193_v39 = vpack.c.bf16 %v591_v14, %v587_v2  ;;  %v2195_v40 = vsub.f32 %v558_v1, %v591_v14 }
  0x7e   : > { %v597_v41 = vand.u32 4294901760, %v563_v16  ;;  %v2197_v42 = vsub.f32 %v561_v4, %v593_v17  ;;  %v599_v46 = vand.u32 4294901760, %v562_v18  ;;  %v2199_v47 = vsub.f32 %v560_v8, %v595_v30 }
  0x7f   : > { %1553 = vmatprep.subr.bf16.mxu1 %v2189_v34  ;;  %1601 = vmatprep.subr.bf16.mxu0 %v2189_v34  ;;  %v565_v48 = vmul.f32 %v515_v51, %v2149_v37  ;;  %v567_v49 = vmul.f32 %v523_v61, %v2149_v37  ;;  %v519_v54 = vrot.slane %v471_v50, %v2070_v27  ;;  %v701_v55 = vand.u32 4294901760, %v2183_v12 }
  0x80   : > { %1555 = vmatpush1.bf16.msra.mxu1 %v2193_v39  ;;  %1603 = vmatpush1.bf16.msra.mxu0 %v2193_v39  ;;  %v2209_v56 = vpack.c.bf16 %v597_v41, %v593_v17  ;;  %v2211_v57 = vsub.f32 %v563_v16, %v597_v41  ;;  %v2213_v58 = vpack.c.bf16 %v599_v46, %v595_v30  ;;  %v713_v59 = vand.u32 4294901760, %v2191_v36 }
  0x81   : > { %v2216_v60 = vsub.f32 %v562_v18, %v599_v46  ;;  %v601_v51 = vand.u32 4294901760, %v565_v48  ;;  %v605_v61 = vand.u32 4294901760, %v567_v49  ;;  %v564_v62 = vmul.f32 %v511_v52, %v2151_v38 }
  0x82   : > { %1557 = vmatprep.subr.bf16.mxu1 %v2209_v56  ;;  %1605 = vmatprep.subr.bf16.mxu0 %v2209_v56  ;;  %v566_v63 = vmul.f32 %v519_v54, %v2151_v38  ;;  %v475_v1 = vcombine.high %v471_v50, %v471_v50  ;;  %v531_v2 = vrot.slane %v2168_v53, %v2064_v24  ;;  %v707_v3 = vand.u32 4294901760, %v2185_v15 }
  0x83   : > { %v2225_v4 = vpack.c.bf16 %v605_v61, %v601_v51  ;;  %v2227_v6 = vsub.f32 %v565_v48, %v601_v51  ;;  %v2229_v8 = vsub.f32 %v567_v49, %v605_v61  ;;  %v603_v9 = vand.u32 4294901760, %v564_v62 }
  0x84   : > { %1559 = vmatpush1.bf16.msra.mxu1 %v2213_v58  ;;  %1607 = vmatpush1.bf16.msra.mxu0 %v2213_v58  ;;  %v607_v52 = vand.u32 4294901760, %v566_v63  ;;  %v539_v14 = vrot.slane %v475_v1, %v2064_v24  ;;  %v569_v50 = vmul.f32 %v531_v2, %v2149_v37  ;;  %v527_v16 = vrot.slane %v2168_v53, %v2070_v27 }
  0x85   : > { %1561 = vmatprep.subr.bf16.mxu1 %v2225_v4  ;;  %1609 = vmatprep.subr.bf16.mxu0 %v2225_v4  ;;  %v2239_v17 = vsub.f32 %v564_v62, %v603_v9  ;;  %v535_v18 = vrot.slane %v475_v1, %v2070_v27  ;;  %v702_v30 = vsub.f32 %v2183_v12, %v701_v55  ;;  %v719_v41 = vand.u32 4294901760, %v2195_v40 }
  0x86   : > { %v2244_v46 = vpack.c.bf16 %v607_v52, %v603_v9  ;;  %v2246_v24 = vsub.f32 %v566_v63, %v607_v52  ;;  %v571_v48 = vmul.f32 %v539_v14, %v2149_v37  ;;  %v609_v49 = vand.u32 4294901760, %v569_v50 }
  0x87   : > { %v568_v53 = vmul.f32 %v527_v16, %v2151_v38  ;;  %v570_v54 = vmul.f32 %v535_v18, %v2151_v38  ;;  %v703_v51 = vand.u32 4294901760, %v702_v30  ;;  %v714_v61 = vsub.f32 %v2191_v36, %v713_v59 }
  0x88   : > { %1563 = vmatpush1.bf16.msra.mxu1 %v2244_v46  ;;  %1611 = vmatpush1.bf16.msra.mxu0 %v2244_v46  ;;  %v613_v27 = vand.u32 4294901760, %v571_v48  ;;  %v2254_v62 = vsub.f32 %v569_v50, %v609_v49  ;;  %v1616_v1 = vpack.c.bf16 %v713_v59, %v701_v55  ;;  %v708_v63 = vsub.f32 %v2185_v15, %v707_v3 }
  0x89   : > { %v611_v2 = vand.u32 4294901760, %v568_v53  ;;  %v615_v37 = vand.u32 4294901760, %v570_v54  ;;  %v715_v9 = vand.u32 4294901760, %v714_v61  ;;  %v720_v52 = vsub.f32 %v2195_v40, %v719_v41 }
  0x8a   : > { %v2258_v14 = vpack.c.bf16 %v613_v27, %v609_v49  ;;  %v2260_v38 = vsub.f32 %v571_v48, %v613_v27  ;;  %v709_v16 = vand.u32 4294901760, %v708_v63  ;;  %v1618_v18 = vpack.c.bf16 %v719_v41, %v707_v3 }
  0x8b   : > { %v2262_v30 = vpack.c.bf16 %v615_v37, %v611_v2  ;;  %v2264_v5 = vsub.f32 %v568_v53, %v611_v2  ;;  %v2266_v50 = vsub.f32 %v570_v54, %v615_v37  ;;  %v1568_v55 = vpack.c.bf16 %v715_v9, %v703_v51 }
  0x8c   : > { %1565 = vmatprep.subr.bf16.mxu1 %v2258_v14  ;;  %1613 = vmatprep.subr.bf16.mxu0 %v2258_v14  ;;  %v721_v59 = vand.u32 4294901760, %v720_v52  ;;  %v725_v61 = vand.u32 4294901760, %v2197_v42  ;;  %v737_v49 = vand.u32 4294901760, %v2211_v57  ;;  %v731_v48 = vand.u32 4294901760, %v2199_v47 }
  0x8d   : > { %1567 = vmatpush1.bf16.msra.mxu1 %v2262_v30  ;;  %1615 = vmatpush1.bf16.msra.mxu0 %v2262_v30  ;;  %v743_v3 = vand.u32 4294901760, %v2216_v60  ;;  %v749_v41 = vand.u32 4294901760, %v2227_v6  ;;  %v761_v53 = vand.u32 4294901760, %v2229_v8  ;;  %v755_v54 = vand.u32 4294901760, %v2239_v17 }
  0x8e   : > { %1569 = vmatprep.subr.bf16.mxu1 %v1568_v55  ;;  %1617 = vmatprep.subr.bf16.mxu0 %v1616_v1  ;;  %v1570_v51 = vpack.c.bf16 %v721_v59, %v709_v16  ;;  %v726_v27 = vsub.f32 %v2197_v42, %v725_v61  ;;  %v738_v63 = vsub.f32 %v2211_v57, %v737_v49  ;;  %v767_v2 = vand.u32 4294901760, %v2246_v24 }
  0x8f   : > { %v1620_v37 = vpack.c.bf16 %v737_v49, %v725_v61  ;;  %v732_v9 = vsub.f32 %v2199_v47, %v731_v48  ;;  %v744_v52 = vsub.f32 %v2216_v60, %v743_v3  ;;  %v1622_v29 = vpack.c.bf16 %v743_v3, %v731_v48 }
  0x90   : > { %671 = vmatmul.mubr.f32.vlgmr.msra.gmra.mrb[0].mxu1 %v670_v43  ;;  %1070 = vmatmul.mubr.f32.vlgmr.msra.gmra.mrb[0].mxu0 %v668_v31  ;;  %v727_v1 = vand.u32 4294901760, %v726_v27  ;;  %v739_v16 = vand.u32 4294901760, %v738_v63  ;;  %v750_v55 = vsub.f32 %v2227_v6, %v749_v41  ;;  %v762_v59 = vsub.f32 %v2229_v8, %v761_v53 }
  0x91   : > { %1571 = vmatpush1.bf16.msra.mxu1 %v1570_v51  ;;  %1619 = vmatpush1.bf16.msra.mxu0 %v1618_v18  ;;  %v733_v61 = vand.u32 4294901760, %v732_v9  ;;  %v745_v49 = vand.u32 4294901760, %v744_v52  ;;  %v1624_v32 = vpack.c.bf16 %v761_v53, %v749_v41  ;;  %v756_v44 = vsub.f32 %v2239_v17, %v755_v54 }
  0x92   : > { %v1572_v48 = vpack.c.bf16 %v739_v16, %v727_v1  ;;  %1621 = vmatprep.subr.bf16.mxu0 %v1620_v37  ;;  %676 = vmatprep.mubr.f32.mxu1 %v1875_v0  ;;  %v751_v22 = vand.u32 4294901760, %v750_v55  ;;  %v763_v43 = vand.u32 4294901760, %v762_v59  ;;  %v768_v31 = vsub.f32 %v2246_v24, %v767_v2 }
  0x93   : > { %v1574_v3 = vpack.c.bf16 %v745_v49, %v733_v61  ;;  %1075 = vmatprep.mubr.f32.mxu0 %v1875_v0  ;;  %v757_v27 = vand.u32 4294901760, %v756_v44  ;;  %v773_v51 = vand.u32 4294901760, %v2254_v62  ;;  %v692_v18 = vand.u32 4294901760, %v2160_v45 }
  0x94   : > { %1573 = vmatprep.subr.bf16.mxu1 %v1572_v48  ;;  %v1576_v41 = vpack.c.bf16 %v763_v43, %v751_v22  ;;  %v2460_v53 = vand.u32 4294901760, %v2144_v25  ;;  %v769_v63 = vand.u32 4294901760, %v768_v31  ;;  %v785_v37 = vand.u32 4294901760, %v2260_v38 }
  0x95   : > { %v779_v9 = vand.u32 4294901760, %v2264_v5  ;;  %1575 = vmatpush1.bf16.msra.mxu1 %v1574_v3  ;;  %1623 = vmatpush1.bf16.msra.mxu0 %v1622_v29  ;;  %v1626_v52 = vpack.c.bf16 %v767_v2, %v755_v54  ;;  %v774_v1 = vsub.f32 %v2254_v62, %v773_v51  ;;  %v791_v44 = vand.u32 4294901760, %v2266_v50 }
  0x96   : > { %682 = vmatmul.mubr.f32.gmra.mrb[2].mxu1 %v2460_v53  ;;  %1577 = vmatprep.subr.bf16.mxu1 %v1576_v41  ;;  %v1578_v45 = vpack.c.bf16 %v769_v63, %v757_v27  ;;  %v786_v16 = vsub.f32 %v2260_v38, %v785_v37  ;;  %v1628_v55 = vpack.c.bf16 %v785_v37, %v773_v51  ;;  %v2461_v25 = vand.u32 4294901760, %v2057_v20 }
  0x97   : > { %1625 = vmatprep.subr.bf16.mxu0 %v1624_v32  ;;  %687 = vmatprep.mubr.f32.mxu1 %v1875_v0  ;;  %v775_v59 = vand.u32 4294901760, %v774_v1  ;;  %v780_v61 = vsub.f32 %v2264_v5, %v779_v9  ;;  %v792_v29 = vsub.f32 %v2266_v50, %v791_v44  ;;  %v1630_v49 = vpack.c.bf16 %v791_v44, %v779_v9 }
  0x98   : > { %1079 = vmatmul.mubr.f32.gmra.mrb[2].mxu0 %v2461_v25  ;;  %v787_v54 = vand.u32 4294901760, %v786_v16  ;;  %v1584_v22 = vpack.c.bf16 %v2191_v36, %v2183_v12  ;;  %v2462_v31 = vand.u32 4294901760, %v2079_v33  ;;  %v1586_v3 = vpack.c.bf16 %v2195_v40, %v2185_v15 }
  0x99   : > { %1084 = vmatprep.mubr.f32.mxu0 %v1875_v0  ;;  %1579 = vmatpush1.bf16.msra.mxu1 %v1578_v45  ;;  %v781_v32 = vand.u32 4294901760, %v780_v61  ;;  %v793_v2 = vand.u32 4294901760, %v792_v29  ;;  %v1588_v27 = vpack.c.bf16 %v2211_v57, %v2197_v42  ;;  %v1590_v12 = vpack.c.bf16 %v2216_v60, %v2199_v47 }
  0x9a   : > { %693 = vmatmul.mubr.f32.gmra.mrb[4].mxu1 %v692_v18  ;;  %1627 = vmatpush1.bf16.msra.mxu0 %v1626_v52  ;;  %v1580_v48 = vpack.c.bf16 %v787_v54, %v775_v59  ;;  %v1592_v15 = vpack.c.bf16 %v2229_v8, %v2227_v6  ;;  %v1596_v36 = vpack.c.bf16 %v2260_v38, %v2254_v62 }
  0x9b   : > { %1629 = vmatprep.subr.bf16.mxu0 %v1628_v55  ;;  %843 = vmatprep.mubr.f32.mxu1 %v1875_v0  ;;  %v1582_v43 = vpack.c.bf16 %v793_v2, %v781_v32 }
  0x9c   : > { %1088 = vmatmul.mubr.f32.gmra.mrb[4].mxu0 %v2462_v31  ;;  %1581 = vmatprep.subr.bf16.mxu1 %v1580_v48 }
  0x9d   : > { %1206 = vmatprep.mubr.f32.mxu0 %v1875_v0  ;;  %1583 = vmatpush1.bf16.msra.mxu1 %v1582_v43 }
  0x9e   : > { %1631 = vmatpush1.bf16.msra.mxu0 %v1630_v49  ;;  %1585 = vmatprep.subr.bf16.mxu1 %v1584_v22 }
  0x9f   : > { %1633 = vmatprep.subr.bf16.mxu0 %v2189_v34  ;;  %v1594_v34 = vpack.c.bf16 %v2246_v24, %v2239_v17 }
  0xa0   : > { %845 = vmatmul.mubr.f32.vlgmr.msra.gmra.mrb[0].mxu1 %v2045_v10 }
  0xa1   : > { %1208 = vmatmul.mubr.f32.vlgmr.msra.gmra.mrb[0].mxu0 %v2045_v10  ;;  %1587 = vmatpush1.bf16.msra.mxu1 %v1586_v3 }
  0xa2   : > { %1635 = vmatpush1.bf16.msra.mxu0 %v2193_v39  ;;  %1589 = vmatprep.subr.bf16.mxu1 %v1588_v27  ;;  %v1598_v39 = vpack.c.bf16 %v2266_v50, %v2264_v5  ;;  %v348_v5 = vsub.s32 2, %v2050_v13 }
  0xa3   : > { %1637 = vmatprep.subr.bf16.mxu0 %v2209_v56  ;;  %850 = vmatprep.mubr.f32.mxu1 %v1875_v0 }
  0xa4   : > { %1213 = vmatprep.mubr.f32.mxu0 %v1875_v0  ;;  %852 = vmatmul.mubr.f32.gmra.mrb[2].mxu1 %v2047_v11  ;;  %v387_v40 = vrot.slane %v2083_v35, %v348_v5  ;;  %v367_v42 = vrot.slane %v2073_v28, %v348_v5 }
  0xa5   : > { %1215 = vmatmul.mubr.f32.gmra.mrb[2].mxu0 %v2047_v11  ;;  %1591 = vmatpush1.bf16.msra.mxu1 %v1590_v12 }
  0xa6   : > { %1639 = vmatpush1.bf16.msra.mxu0 %v2213_v58  ;;  %1593 = vmatprep.subr.bf16.mxu1 %v1592_v15  ;;  %v377_v60 = vrot.slane %v367_v42, %v348_v5 }
  0xa7   : > { %1641 = vmatprep.subr.bf16.mxu0 %v2225_v4  ;;  %857 = vmatprep.mubr.f32.mxu1 %v1875_v0 }
  0xa8   : > { %1220 = vmatprep.mubr.f32.mxu0 %v1875_v0  ;;  %859 = vmatmul.mubr.f32.gmra.mrb[4].mxu1 %v2059_v21 }
  0xa9   : > { %1222 = vmatmul.mubr.f32.gmra.mrb[4].mxu0 %v2059_v21  ;;  %1595 = vmatpush1.bf16.msra.mxu1 %v1594_v34 }
  0xaa   : > { %1643 = vmatpush1.bf16.msra.mxu0 %v2244_v46  ;;  %1597 = vmatprep.subr.bf16.mxu1 %v1596_v36 }
  0xab   : > { %1645 = vmatprep.subr.bf16.mxu0 %v2258_v14  ;;  %961 = vmatprep.mubr.f32.mxu1 %v1875_v0 }
  0xac   : > { %1308 = vmatprep.mubr.f32.mxu0 %v1875_v0 }
  0xad   : > { %1599 = vmatpush1.bf16.msra.mxu1 %v1598_v39 }
  0xae   : > { %1647 = vmatpush1.bf16.msra.mxu0 %v2262_v30 }
  0xb0   : > { %964 = vmatmul.mubr.f32.vlgmr.msra.gmra.mrb[0].mxu1 %v2054_v19  ;;  %v349_v19 = vrot.slane %v2067_v26, %v348_v5 }
  0xb1   : > { %1310 = vmatmul.mubr.f32.vlgmr.msra.gmra.mrb[0].mxu0 %v2045_v10  ;;  %969 = vmatprep.mubr.f32.mxu1 %v1875_v0  ;;  %v352_v10 = vsub.s32 6, %v2050_v13 }
  0xb2   : > { %1315 = vmatprep.mubr.f32.mxu0 %v1875_v0  ;;  %v357_v47 = vrot.slane %v349_v19, %v348_v5 }
  0xb3   : > { %v409_v56 = vrot.slane %v2061_v23, %v352_v10 }
  0xb4   : > { %972 = vmatmul.mubr.f32.gmra.mrb[2].mxu1 %v2057_v20  ;;  %v353_v20 = vrot.slane %v2067_v26, %v352_v10  ;;  %vm362_vm9 = vcmp.eq.s32.totalorder %v2050_v13, %v357_v47 }
  0xb5   : > { %1317 = vmatmul.mubr.f32.gmra.mrb[2].mxu0 %v2047_v11  ;;  %977 = vmatprep.mubr.f32.mxu1 %v1875_v0  ;;  %v391_v11 = vrot.slane %v2083_v35, %v352_v10  ;;  %v419_v35 = vrot.slane %v409_v56, %v348_v5  ;;  %v382_v6 = vsel %vm362_vm9, %v377_v60, 0.0 }
  0xb6   : > { %1322 = vmatprep.mubr.f32.mxu0 %v1875_v0  ;;  %v405_v0 = vrot.slane %v2061_v23, %v348_v5  ;;  %v361_v57 = vrot.slane %v353_v20, %v348_v5 }
  0xb7   : > { %v399_v58 = vrot.slane %v391_v11, %v348_v5 }
  0xb8   : > { %980 = vmatmul.mubr.f32.gmra.mrb[4].mxu1 %v2079_v33  ;;  %v395_v33 = vrot.slane %v387_v40, %v348_v5  ;;  %v415_v4 = vrot.slane %v405_v0, %v348_v5  ;;  %vm363_vm11 = vcmp.eq.s32.totalorder %v2050_v13, %v361_v57 }
  0xb9   : > { %1324 = vmatmul.mubr.f32.gmra.mrb[4].mxu0 %v2059_v21  ;;  %v371_v21 = vrot.slane %v2073_v28, %v352_v10  ;;  %vm401_vm12 = vcmp.eq.s32.totalorder %v2050_v13, %v399_v58 }
  0xba   : > { %vm400_vm10 = vcmp.eq.s32.totalorder %v2050_v13, %v395_v33  ;;  %v421_v28 = vsel %vm401_vm12, %v419_v35, 0.0 }
  0xbb   : > { %v381_v26 = vrot.slane %v371_v21, %v348_v5  ;;  %v420_v8 = vsel %vm400_vm10, %v415_v4, 0.0 }
  0xbc   : > { %v422_v46 = vadd.f32 %v420_v8, %v382_v6 }
  0xbd   : > { %v383_v17 = vsel %vm363_vm11, %v381_v26, 0.0 }
  0xbe   : > { %v423_v62 = vadd.f32 %v421_v28, %v383_v17  ;;  %v2463_v17 = vlaneseq }
  0xc0   : > { %vm2375_vm13 = vcmp.lt.s32.totalorder %v2463_v17, 256 }
 0x183   : > { %v965_v23 = vpop.f32.mrb[0].mxu1 }
 0x184   : > { %v1311_v24 = vpop.f32.mrb[0].mxu0  ;;  %v967_v38 = vpop.f32.mrb[1].mxu1 }
 0x185   : > { %v1648_v14 = vadd.f32 %v1311_v24, %v965_v23  ;;  %v1313_v30 = vpop.f32.mrb[1].mxu0 }
 0x186   : > { %v1649_v50 = vadd.f32 %v1313_v30, %v967_v38 }
 0x187   : > { %v1330_v51 = vmul.f32 %v1648_v14, %v422_v46  ;;  %v973_v41 = vpop.f32.mrb[2].mxu1 }
 0x188   : > { %v1331_v18 = vmul.f32 %v1649_v50, %v423_v62  ;;  %v1318_v53 = vpop.f32.mrb[2].mxu0  ;;  %v975_v9 = vpop.f32.mrb[3].mxu1 }
 0x189   : > { %v1332_v63 = vrot.slane %v1330_v51, 4  ;;  %v1650_v37 = vadd.f32 %v1318_v53, %v973_v41  ;;  %v1320_v13 = vpop.f32.mrb[3].mxu0 }
 0x18a   : > { %v1338_v52 = vrot.slane %v1331_v18, 4  ;;  %v1651_v1 = vadd.f32 %v1320_v13, %v975_v9 }
 0x18b   : > { %v1333_v44 = vadd.f32 %v1332_v63, %v1330_v51  ;;  %v1367_v45 = vmul.f32 %v1650_v37, %v422_v46  ;;  %v981_v25 = vpop.f32.mrb[4].mxu1 }
 0x18c   : > { %v1339_v16 = vadd.f32 %v1338_v52, %v1331_v18  ;;  %v1368_v55 = vmul.f32 %v1651_v1, %v423_v62  ;;  %v1325_v59 = vpop.f32.mrb[4].mxu0  ;;  %v983_v32 = vpop.f32.mrb[5].mxu1 }
 0x18d   : > { %v1334_v61 = vrot.slane %v1333_v44, 2  ;;  %v1369_v29 = vrot.slane %v1367_v45, 4  ;;  %v1652_v54 = vadd.f32 %v1325_v59, %v981_v25  ;;  %v1327_v2 = vpop.f32.mrb[5].mxu0 }
 0x18e   : > { %v1340_v49 = vrot.slane %v1339_v16, 2  ;;  %v1375_v48 = vrot.slane %v1368_v55, 4  ;;  %v1653_v22 = vadd.f32 %v1327_v2, %v983_v32 }
 0x18f   : > { %v1335_v43 = vadd.f32 %v1334_v61, %v1333_v44  ;;  %v1370_v31 = vadd.f32 %v1369_v29, %v1367_v45  ;;  %v1401_v3 = vmul.f32 %v1652_v54, %v422_v46 }
 0x190   : > { %v1341_v27 = vadd.f32 %v1340_v49, %v1339_v16  ;;  %v1376_v12 = vadd.f32 %v1375_v48, %v1368_v55  ;;  %v1402_v15 = vmul.f32 %v1653_v22, %v423_v62 }
 0x191   : > { %v1336_v34 = vrot.slane %v1335_v43, 1  ;;  %v1371_v36 = vrot.slane %v1370_v31, 2  ;;  %v1403_v39 = vrot.slane %v1401_v3, 4 }
 0x192   : > { %v1342_v5 = vrot.slane %v1341_v27, 1  ;;  %v1377_v10 = vrot.slane %v1376_v12, 2  ;;  %v1409_v19 = vrot.slane %v1402_v15, 4 }
 0x193   : > { %v1337_v40 = vadd.f32 %v1336_v34, %v1335_v43  ;;  %v1372_v20 = vadd.f32 %v1371_v36, %v1370_v31  ;;  %v1404_v11 = vadd.f32 %v1403_v39, %v1401_v3 }
 0x194   : > { %v1343_v42 = vadd.f32 %v1342_v5, %v1341_v27  ;;  %v1378_v0 = vadd.f32 %v1377_v10, %v1376_v12  ;;  %v1410_v47 = vadd.f32 %v1409_v19, %v1402_v15 }
 0x195   : > { %v1373_v33 = vrot.slane %v1372_v20, 1  ;;  %v1405_v21 = vrot.slane %v1404_v11, 2 }
 0x196   : > { %v1346_v56 = vcombine.low %v1337_v40, %v1343_v42  ;;  %v1379_v57 = vrot.slane %v1378_v0, 1  ;;  %v1411_v58 = vrot.slane %v1410_v47, 2 }
 0x197   : > { %v1374_v60 = vadd.f32 %v1373_v33, %v1372_v20  ;;  %v1406_v4 = vadd.f32 %v1405_v21, %v1404_v11 }
 0x198   : > { %v1353_v26 = vrot.slane %v1346_v56, %v2127_v7  ;;  %v1380_v35 = vadd.f32 %v1379_v57, %v1378_v0  ;;  %v1412_v6 = vadd.f32 %v1411_v58, %v1410_v47 }
 0x199   : > { %v1407_v8 = vrot.slane %v1406_v4, 1 }
 0x19a   : > { %v1360_v46 = vrot.slane %v1353_v26, %v2127_v7  ;;  %v1383_v23 = vcombine.low %v1374_v60, %v1380_v35  ;;  %v1413_v24 = vrot.slane %v1412_v6, 1 }
 0x19b   : > { %v1408_v62 = vadd.f32 %v1407_v8, %v1406_v4 }
 0x19c   : > { %v1390_v14 = vrot.slane %v1383_v23, %v2127_v7  ;;  %v1414_v38 = vadd.f32 %v1413_v24, %v1412_v6  ;;  %1366 = vst.msk [vmem:[%s174_s15] ss:$4 sm:$0x3] %vm2375_vm13, %v1360_v46 }
 0x19e   : > { %v1397_v30 = vrot.slane %v1390_v14, %v2127_v7  ;;  %v1417_v50 = vcombine.low %v1408_v62, %v1414_v38 }
 0x1a0   : > { %v1424_v51 = vrot.slane %v1417_v50, %v2127_v7  ;;  %1543 = vst.msk [vmem:[%s174_s15 + $0x1] ss:$4 sm:$0x3] %vm2375_vm13, %v1397_v30 }
 0x1a2   : > { %v1431_v18 = vrot.slane %v1424_v51, %v2127_v7 }
 0x1a4   : > { %1544 = vst.msk [vmem:[%s174_s15 + $0x2] ss:$4 sm:$0x3] %vm2375_vm13, %v1431_v18 }
 0x1a5   : > { %1812 = shalt.err (!%p1809_p7)
}
 0x1a6   : > { %s1813_s6 = scalar_lea.hbm %s2394_s29, 128  ;;  %s1817_s24 = scalar_lea.hbm %s2442_s2, 256 }
 0x1a7   : > { %p1814_p9 = scmp.ne.s32.totalorder %s2394_s29, %s1813_s6  ;;  %p1818_p0 = scmp.lt.u32.totalorder %s2394_s29, %s2442_s2 }
 0x1a8   : > { %p1819_p1 = scmp.lt.u32.totalorder %s1817_s24, %s1813_s6  ;;  %p1821_p4 = scmp.lt.u32.totalorder %s1813_s6, %s2394_s29 }
 0x1a9   : > { %p1815_p2 = pnand %p1814_p9, %p1984_p12 }
 0x1aa   : > { %p1820_p11 = por %p1819_p1, %p1818_p0 }
 0x1ab   : > { %p1816_p5 = pneg %p1815_p2 }
 0x1ac   : > { %p1822_p6 = por %p1821_p4, %p1820_p11 }
 0x1ae   : > { %p1823_p8 = pnand %p1822_p6, %p1816_p5 }
 0x1b0   : > { %1826 = shalt.err (!%p1823_p8)
}
 0x1b1   : > { %1686 = dma.vmem_to_hbm [thread:$0]  (%p1984_p12), %s2396_s22, 128, %s2394_s29, %s1436_s13  }
 0x1b2 PF: > { %s1462_s26 = sand.u32 1, %s1857_s9   ;;  %p2466_p10 = scmp.ne.s32.totalorder %s2450_s16, 0 }
 0x1b3   : > { %p2467_p13 = scmp.ge.s32.totalorder %s1869_s12, 2  ;;  %s1463_s19 = scalar_lea.sflag [#allocation4], %s1462_s26 }
 0x1b5   : > { %p1697_p3 = pnand %p2467_p13, %p2466_p10 }
 0x1b7   : > { %1852 = dma.done.wait (!%p1697_p3), %s1463_s19, 128  }
 0x1b8   : > { %1854 = vsyncadd (!%p1697_p3), %s1463_s19, 4294967168  ;;  %p16_p7 = scmp.ge.s32.totalorder %s1949_s21, 4   ;;  %s2468_s9 = smov %s1861_s10 }
 0x1b9   : > { %s2469_s10 = smov %s1865_s11  ;;  %s2470_s11 = smov %s1980_s8 }
 0x1ba   : > { %s2471_s12 = smov %s1949_s21  ;;  %18 = sbr.rel (!%p16_p7) target bundleno = 6 (0x6), region = 80 }
 0x1c1   :  { %1468 = vsyncpa [#allocation3], 1 }
 0x1c2   :  { %1470 = vsyncpa [#allocation3 + $0x1], 1 }
 0x1c3   :  { %1471 = vsyncpa [#allocation6], 1 }
 0x1c4   :  { %1473 = vsyncpa [#allocation6 + $0x1], 1 }
 0x1c5   :  { %1474 = vsyncpa [#allocation4], 1 }
 0x1c6   :  { %1476 = vsyncpa [#allocation4 + $0x1], 1 }

</bundles_post_ra>
